<compile_context>
chip_gen: v7x
topology: tpu7x:2x2x1
jax: 0.10.0
libtpu: 0.0.40
codegen_flags: <defaults>
</compile_context>

<pallas_src>
import jax
import jax.numpy as jnp
from jax.experimental import pallas as pl
from jax.experimental.pallas import tpu as pltpu


def _scores_kernel(m_ref, q_ref, colmax_ref, diag_ref, rowmax_ref, acc_ref):
    j = pl.program_id(0)  # column-tile index (columns of scores == rows of q)
    k = pl.program_id(1)  # contraction (D) tile index

    @pl.when(k == 0)
    def _():
        acc_ref[...] = jnp.zeros_like(acc_ref)

    # scores[:, j_tile] += m[:, k_tile] @ q[j_tile, k_tile]^T   (MXU, f32 acc)
    acc_ref[...] += jax.lax.dot_general(
        m_ref[...], q_ref[...],
        dimension_numbers=(((1,), (1,)), ((), ())),
        preferred_element_type=jnp.float32,
    )

    @pl.when(k == pl.num_programs(1) - 1)
    def _():
        scores = acc_ref[...]                                   # (N, TN) f32
        n_rows, tn = scores.shape
        row_ids = jax.lax.broadcasted_iota(jnp.int32, (n_rows, tn), 0)
        col_ids = jax.lax.broadcasted_iota(jnp.int32, (n_rows, tn), 1) + j * tn
        is_diag = row_ids == col_ids

        # diag(scores) restricted to this column tile: each column holds at
        # most one diagonal element, so a masked sum extracts it.
        diag_ref[...] = jnp.sum(jnp.where(is_diag, scores, 0.0),
                                axis=0, keepdims=True)          # (1, TN)

        # scores - diag(diag(scores)): diagonal becomes exactly 0.
        scores_z = jnp.where(is_diag, 0.0, scores)

        # top-1 over rows for each column  -> max_q contribution
        colmax_ref[...] = jnp.max(scores_z, axis=0, keepdims=True)  # (1, TN)

        # top-1 over this column tile for each row -> partial max_m,
        # combined across column tiles (elementwise max) in the wrapper.
        rowmax = jnp.max(scores_z, axis=1, keepdims=True)        # (N, 1)
        rowmax_ref[...] = rowmax[None]                           # (1, N, 1)


def _pick_tile(dim, candidates=(512, 256, 128)):
    """Largest lane-friendly tile dividing `dim`, else the full dimension."""
    for c in candidates:
        if dim >= c and dim % c == 0:
            return c
    return dim


def trip_loss3(m, q, labels, *, contrast=True):
    """m: (N, D); q: (N, 1, D) or (N, D); labels: (N,). Returns scalar f32."""
    if q.ndim == 3:
        q = q[:, 0, :]                      # torch: q.squeeze(1)
    n, d = m.shape
    tn = _pick_tile(n)
    tk = _pick_tile(d)
    num_j = n // tn
    num_k = d // tk

    colmax_o, diag_o, rowmax_o = pl.pallas_call(
        _scores_kernel,
        out_shape=(
            jax.ShapeDtypeStruct((1, n), jnp.float32),           # column max
            jax.ShapeDtypeStruct((1, n), jnp.float32),           # diagonal
            jax.ShapeDtypeStruct((num_j, n, 1), jnp.float32),    # row max / tile
        ),
        grid_spec=pltpu.PrefetchScalarGridSpec(
            num_scalar_prefetch=0,
            grid=(num_j, num_k),
            in_specs=[
                pl.BlockSpec((n, tk), lambda j, k: (0, k)),      # m rows x D chunk
                pl.BlockSpec((tn, tk), lambda j, k: (j, k)),     # q rows x D chunk
            ],
            out_specs=[
                pl.BlockSpec((1, tn), lambda j, k: (0, j)),
                pl.BlockSpec((1, tn), lambda j, k: (0, j)),
                pl.BlockSpec((1, n, 1), lambda j, k: (j, 0, 0)),
            ],
            scratch_shapes=[pltpu.VMEM((n, tn), jnp.float32)],   # score accumulator
        ),
        compiler_params=pltpu.CompilerParams(
            dimension_semantics=("parallel", "arbitrary"),
            vmem_limit_bytes=48 * 1024 * 1024,
        ),
    )(m, q)

    max_q = colmax_o[0]                       # (N,)
    diag = diag_o[0]                          # (N,)
    max_m = jnp.max(rowmax_o[:, :, 0], axis=0)  # (N,)

    labels = labels.astype(jnp.float32)
    # tar1[i] = 1 if max_q[i] == labels[i] else -1 (literal float equality,
    # as in the PyTorch module).
    tar1 = jnp.where(max_q == labels, 1.0, -1.0)

    # nn.MarginRankingLoss() default margin = 0.0 (self.margin is not passed
    # to the criterion in the original module).
    margin = 0.0
    neg_q = jnp.mean(jnp.maximum(-tar1 * (max_q - diag) + margin, 0.0))
    tar2 = jnp.zeros((1, n), jnp.float32)
    # Structurally zero for finite scores (target == 0, margin == 0); kept
    # literal for fidelity.
    neg_m = jnp.mean(
        jnp.maximum(-tar2 * (max_m[:, None] - diag[None, :]) + margin, 0.0))

    return neg_m + neg_q if contrast else neg_m


if __name__ == "__main__":
    key = jax.random.PRNGKey(0)
    k1, k2, k3 = jax.random.split(key, 3)

    N, D = 8, 384  # small shapes; D=384 -> tk=128, so the k-reduction grid runs
    m = jax.random.normal(k1, (N, D), dtype=jnp.float32)
    q = jax.random.normal(k2, (N, 1, D), dtype=jnp.float32)
    labels = jax.random.randint(k3, (N,), 0, 10).astype(jnp.float32)

    loss = trip_loss3(m, q, labels)
    jax.block_until_ready(loss)

    # pure-JAX reference (literal transcription of the PyTorch forward)
    q2 = q[:, 0, :]
    scores = m @ q2.T
    diag = jnp.diag(scores)
    scores_z = scores - jnp.diag(diag)
    max_q = jnp.max(scores_z, axis=0)
    max_m = jnp.max(scores_z, axis=1)
    tar1 = jnp.where(max_q == labels, 1.0, -1.0)
    neg_q = jnp.mean(jnp.maximum(-tar1 * (max_q - diag), 0.0))
    tar2 = jnp.zeros((1, N), jnp.float32)
    neg_m = jnp.mean(jnp.maximum(-tar2 * (max_m[:, None] - diag[None, :]), 0.0))
    ref = neg_m + neg_q

    assert jnp.allclose(loss, ref, rtol=2e-2, atol=2e-2), (loss, ref)
    print("KERNEL_OK")
</pallas_src>

<mosaic_0001>
module attributes {stable_mosaic.version = 11 : i64} {
  func.func @_scores_kernel(%arg0: i32, %arg1: i32, %arg2: memref<8x128xf32, #tpu.memory_space<vmem>>, %arg3: memref<8x128xf32, #tpu.memory_space<vmem>>, %arg4: memref<1x8xf32, #tpu.memory_space<vmem>>, %arg5: memref<1x8xf32, #tpu.memory_space<vmem>>, %arg6: memref<1x8x1xf32, #tpu.memory_space<vmem>>, %arg7: memref<8x8xf32, #tpu.memory_space<vmem>>) attributes {dimension_semantics = [#tpu.dimension_semantics<parallel>, #tpu.dimension_semantics<arbitrary>], iteration_bounds = array<i64: 1, 3>, scalar_prefetch = 0 : i64, scratch_operands = 1 : i64, tpu.core_type = #tpu.core_type<tc>, window_params = [{transform_indices = @transform_0, window_bounds = array<i64: 8, 128>}, {transform_indices = @transform_1, window_bounds = array<i64: 8, 128>}, {transform_indices = @transform_2, window_bounds = array<i64: 1, 8>}, {transform_indices = @transform_3, window_bounds = array<i64: 1, 8>}, {transform_indices = @transform_4, window_bounds = array<i64: 1, 8, 1>}]} {
    %c0_i32 = arith.constant 0 : i32
    %0 = arith.cmpi eq, %arg1, %c0_i32 : i32
    %1 = arith.extui %0 : i1 to i32
    %c0_i32_0 = arith.constant 0 : i32
    %2 = arith.cmpi ne, %1, %c0_i32_0 : i32
    scf.if %2 {
      %cst_9 = arith.constant 0.000000e+00 : f32
      %12 = vector.broadcast %cst_9 : f32 to vector<8x8xf32>
      %c0_10 = arith.constant 0 : index
      %c0_11 = arith.constant 0 : index
      %13 = vector.load %arg7[%c0_10, %c0_11] : memref<8x8xf32, #tpu.memory_space<vmem>>, vector<8x8xf32>
      tpu.vector_store %arg7[%c0_10, %c0_11], %12 {strides = array<i32>} : memref<8x8xf32, #tpu.memory_space<vmem>>, vector<8x8xf32>,
    } else {
    }
    %c0 = arith.constant 0 : index
    %c0_1 = arith.constant 0 : index
    %3 = vector.load %arg7[%c0, %c0_1] : memref<8x8xf32, #tpu.memory_space<vmem>>, vector<8x8xf32>
    %c0_2 = arith.constant 0 : index
    %c0_3 = arith.constant 0 : index
    %4 = vector.load %arg2[%c0_2, %c0_3] : memref<8x128xf32, #tpu.memory_space<vmem>>, vector<8x128xf32>
    %c0_4 = arith.constant 0 : index
    %c0_5 = arith.constant 0 : index
    %5 = vector.load %arg3[%c0_4, %c0_5] : memref<8x128xf32, #tpu.memory_space<vmem>>, vector<8x128xf32>
    %cst = arith.constant dense<0.000000e+00> : vector<8x8xf32>
    %6 = tpu.matmul %4, %5, %cst {dimension_numbers = #tpu.dot_dimension_numbers<[1], [1], [0], [0], [0, 0, 1, 0], [], []>} : vector<8x128xf32>, vector<8x128xf32>, vector<8x8xf32> -> vector<8x8xf32>
    %7 = arith.addf %3, %6 : vector<8x8xf32>
    %c0_6 = arith.constant 0 : index
    %c0_7 = arith.constant 0 : index
    %8 = vector.load %arg7[%c0_6, %c0_7] : memref<8x8xf32, #tpu.memory_space<vmem>>, vector<8x8xf32>
    tpu.vector_store %arg7[%c0_6, %c0_7], %7 {strides = array<i32>} : memref<8x8xf32, #tpu.memory_space<vmem>>, vector<8x8xf32>,
    %c2_i32 = arith.constant 2 : i32
    %9 = arith.cmpi eq, %arg1, %c2_i32 : i32
    %10 = arith.extui %9 : i1 to i32
    %c0_i32_8 = arith.constant 0 : i32
    %11 = arith.cmpi ne, %10, %c0_i32_8 : i32
    scf.if %11 {
      %c0_9 = arith.constant 0 : index
      %c0_10 = arith.constant 0 : index
      %12 = vector.load %arg7[%c0_9, %c0_10] : memref<8x8xf32, #tpu.memory_space<vmem>>, vector<8x8xf32>
      %13 = tpu.iota {dimensions = array<i32: 0>} : vector<8x8xi32>
      %14 = tpu.iota {dimensions = array<i32: 1>} : vector<8x8xi32>
      %c8_i32 = arith.constant 8 : i32
      %15 = arith.muli %arg0, %c8_i32 : i32
      %16 = vector.broadcast %15 : i32 to vector<8x8xi32>
      %17 = arith.addi %14, %16 : vector<8x8xi32>
      %18 = arith.cmpi eq, %13, %17 : vector<8x8xi32>
      %cst_11 = arith.constant 0.000000e+00 : f32
      %19 = vector.broadcast %cst_11 : f32 to vector<8x8xf32>
      %20 = arith.select %18, %12, %19 : vector<8x8xi1>, vector<8x8xf32>
      %cst_12 = arith.constant dense<0.000000e+00> : vector<8xf32>
      %21 = vector.multi_reduction <add>, %20, %cst_12 [0] : vector<8x8xf32> to vector<8xf32>
      %22 = vector.shape_cast %21 : vector<8xf32> to vector<1x8xf32>
      %c0_13 = arith.constant 0 : index
      %c0_14 = arith.constant 0 : index
      %23 = vector.load %arg5[%c0_13, %c0_14] : memref<1x8xf32, #tpu.memory_space<vmem>>, vector<1x8xf32>
      tpu.vector_store %arg5[%c0_13, %c0_14], %22 {strides = array<i32>} : memref<1x8xf32, #tpu.memory_space<vmem>>, vector<1x8xf32>,
      %cst_15 = arith.constant 0.000000e+00 : f32
      %24 = vector.broadcast %cst_15 : f32 to vector<8x8xf32>
      %25 = arith.select %18, %24, %12 : vector<8x8xi1>, vector<8x8xf32>
      %cst_16 = arith.constant dense<0xFF800000> : vector<8xf32>
      %26 = vector.multi_reduction <maximumf>, %25, %cst_16 [0] : vector<8x8xf32> to vector<8xf32>
      %27 = vector.shape_cast %26 : vector<8xf32> to vector<1x8xf32>
      %c0_17 = arith.constant 0 : index
      %c0_18 = arith.constant 0 : index
      %28 = vector.load %arg4[%c0_17, %c0_18] : memref<1x8xf32, #tpu.memory_space<vmem>>, vector<1x8xf32>
      tpu.vector_store %arg4[%c0_17, %c0_18], %27 {strides = array<i32>} : memref<1x8xf32, #tpu.memory_space<vmem>>, vector<1x8xf32>,
      %cst_19 = arith.constant dense<0xFF800000> : vector<8xf32>
      %29 = vector.multi_reduction <maximumf>, %25, %cst_19 [1] : vector<8x8xf32> to vector<8xf32>
      %30 = vector.shape_cast %29 : vector<8xf32> to vector<8x1xf32>
      %31 = vector.shape_cast %30 : vector<8x1xf32> to vector<1x8x1xf32>
      %c0_20 = arith.constant 0 : index
      %c0_21 = arith.constant 0 : index
      %c0_22 = arith.constant 0 : index
      %32 = vector.load %arg6[%c0_20, %c0_21, %c0_22] : memref<1x8x1xf32, #tpu.memory_space<vmem>>, vector<1x8x1xf32>
      tpu.vector_store %arg6[%c0_20, %c0_21, %c0_22], %31 {strides = array<i32>} : memref<1x8x1xf32, #tpu.memory_space<vmem>>, vector<1x8x1xf32>,
    } else {
    }
    return
  }
  func.func @transform_0(%arg0: i32, %arg1: i32) -> (i32, i32) {
    %c0_i32 = arith.constant 0 : i32
    %c0_i32_0 = arith.constant 0 : i32
    return %c0_i32, %arg1 : i32, i32
  }
  func.func @transform_1(%arg0: i32, %arg1: i32) -> (i32, i32) {
    %c0_i32 = arith.constant 0 : i32
    return %arg0, %arg1 : i32, i32
  }
  func.func @transform_2(%arg0: i32, %arg1: i32) -> (i32, i32) {
    %c0_i32 = arith.constant 0 : i32
    %c0_i32_0 = arith.constant 0 : i32
    return %c0_i32, %arg0 : i32, i32
  }
  func.func @transform_3(%arg0: i32, %arg1: i32) -> (i32, i32) {
    %c0_i32 = arith.constant 0 : i32
    %c0_i32_0 = arith.constant 0 : i32
    return %c0_i32, %arg0 : i32, i32
  }
  func.func @transform_4(%arg0: i32, %arg1: i32) -> (i32, i32, i32) {
    %c0_i32 = arith.constant 0 : i32
    %c0_i32_0 = arith.constant 0 : i32
    %c0_i32_1 = arith.constant 0 : i32
    return %arg0, %c0_i32, %c0_i32_0 : i32, i32, i32
  }
}

</mosaic_0001>

<bundles_post_ra>
// kernel: tpu_custom_call.1
= control target key start
LH: loop header
LB: loop body
LE: loop exit
PB: predicated region body
PF: predicated region fallthrough
CT: control target
= control target key end

     0   :  { %10 = vsyncpa [#allocation4], 0  ;;  %s1083_s0 = inlined_call_operand.hbm [shape: f32[8,384], index: 0, kind: input, shape index: {}]   ;;  %s1084_s1 = inlined_call_operand.hbm [shape: f32[8,384], index: 1, kind: input, shape index: {}]   ;;  %s1085_s2 = inlined_call_operand.hbm [shape: f32[1,8], index: 2, kind: output, shape index: {0}]   ;;  %s1086_s3 = inlined_call_operand.hbm [shape: f32[1,8], index: 3, kind: output, shape index: {1}]   ;;  %s1087_s4 = inlined_call_operand.vmem [shape: f32[1,8,1], index: 4, kind: output, shape index: {2}]  }
   0x1   :  { %12 = vsyncpa [#allocation4 + $0x1], 0 }
   0x2   :  { %13 = vsyncpa [#allocation7], 0 }
   0x3   :  { %15 = vsyncpa [#allocation7 + $0x1], 0 }
   0x4   :  { %16 = vsyncpa [#allocation5], 0 }
   0x5   :  { %17 = vsyncpa [#allocation10], 0  ;;  %s851_s15 = smov 0   ;;  %s853_s16 = smov 0  }
   0x6   :  { %s855_s17 = smov 0   ;;  %s857_s18 = smov 0  }
   0x7   :  { %s859_s19 = smov 0   ;;  %s861_s20 = smov 0  }
   0x8 LB: > { %s540_s21 = sadd.s32 4294967295, %s817_s20   ;;  %s32_s22 = sadd.s32 1, %s813_s19  ;;  %s817_s20 = sphi %s861_s20, %s23_s20   ;;  %s813_s19 = sphi %s859_s19, %s1102_s19   ;;  %s809_s18 = sphi %s857_s18, %s1101_s18   ;;  %s805_s17 = sphi %s855_s17, %s1100_s17   ;;  %s801_s16 = sphi %s853_s16, %s1099_s16   ;;  %s797_s15 = sphi %s851_s15, %s1098_s15  }
   0x9   : > { %p33_p0 = scmp.ge.s32.totalorder %s32_s22, 3  ;;  %s42_s23 = sadd.s32 1, %s805_s17 }
   0xa   : > { %p49_p1 = scmp.ne.s32.totalorder %s805_s17, %s801_s16  ;;  %p50_p2 = scmp.eq.s32.totalorder %s817_s20, 0 }
   0xb   : > { %s1104_s22 = smov (%p33_p0, %s32_s22), 0  ;;  %p55_p4 = scmp.ne.s32.totalorder %s801_s16, %s797_s15 }
   0xc   : > { %p887_p3 = por %p50_p2, %p49_p1  ;;  %s39_s25 = ssub.s32 %s813_s19, %s1104_s22 }
   0xd   : > { %p56_p5 = scmp.eq.s32.totalorder %s540_s21, 0  ;;  %p40_p6 = scmp.eq.s32.totalorder %s39_s25, 0 }
   0xe   : > { %p585_p8 = scmp.lt.s32.totalorder %s817_s20, 3  ;;  %s905_s28 = sand.u32 1, %s805_s17  }
   0xf   : > { %p896_p7 = por %p56_p5, %p55_p4  ;;  %s544_s29 = sshll.u32 %s813_s19, 7 }
  0x10   : > { %s902_s27 = scalar_select %p40_p6, %s805_s17, %s42_s23  }
  0x11   : > { %s1090_s26 = scalar_select %p896_p7, 1, 0 }
  0x12   : > { %s543_s30 = sshll.u32 %s905_s28, 3  ;;  %s914_s7 = scalar_lea.hbm %s1083_s0, %s544_s29 }
  0x13   : > { %s189_s8 = scalar_lea.vmem [#allocation3], %s543_s30  ;;  %p920_p9 = pnand %p585_p8, %p887_p3 }
  0x14   : > { %s196_s9 = sshll.u32 %s189_s8, 4  ;;  %s186_s11 = scalar_lea.sflag [#allocation4], %s905_s28  ;;  %s924_s9 = int_to_ptr.vmem [resolvable:$true] %s196_s9 }
  0x15   : > { %s643_s12 = scalar_lea.hbm %s914_s7, 128  ;;  %p645_p13 = pneg %p920_p9 }
  0x16   : > { %p644_p12 = scmp.ne.s32.totalorder %s914_s7, %s643_s12  ;;  %s648_s15 = scalar_lea.hbm %s1083_s0, 384 }
  0x17   : > { %p649_p2 = scmp.lt.u32.totalorder %s914_s7, %s1083_s0  ;;  %p650_p3 = scmp.lt.u32.totalorder %s648_s15, %s643_s12 }
  0x18   : > { %p646_p0 = pnand %p645_p13, %p644_p12  ;;  %p652_p5 = scmp.lt.u32.totalorder %s643_s12, %s914_s7 }
  0x19   : > { %p651_p4 = por %p650_p3, %p649_p2 }
  0x1a   : > { %p647_p1 = pneg %p646_p0 }
  0x1b   : > { %p653_p6 = por %p652_p5, %p651_p4 }
  0x1d   : > { %p654_p8 = pnand %p653_p6, %p647_p1 }
  0x1f   : > { %657 = shalt.err (!%p654_p8)
}
  0x20   : > { %s658_s25 = scalar_lea.vmem %s924_s9, 128  ;;  %s819_s5 = smov [#allocation3]  }
  0x21   : > { %p659_p12 = scmp.ne.s32.totalorder %s924_s9, %s658_s25  ;;  %s663_s6 = sshll.u32 %s819_s5, 4  ;;  %s664_s6 = int_to_ptr.vmem [resolvable:$false] %s663_s6 }
  0x22   : > { %s665_s8 = scalar_lea.vmem %s664_s6, 256  ;;  %p666_p11 = scmp.lt.s32.totalorder %s924_s9, %s664_s6 }
  0x23   : > { %p661_p0 = pnand %p659_p12, %p645_p13  ;;  %p667_p2 = scmp.lt.s32.totalorder %s665_s8, %s658_s25 }
  0x25   : > { %p662_p10 = pneg %p661_p0  ;;  %p668_p3 = por %p667_p2, %p666_p11 }
  0x27   : > { %p669_p4 = pnand %p668_p3, %p662_p10 }
  0x29   : > { %672 = shalt.err (!%p669_p4)
}
  0x2a   : > { %581 = dma.hbm_to_vmem [thread:$0]  (!%p920_p9), %s914_s7, 128, %s924_s9, %s186_s11  }
  0x2b   : > { %p1092_p1 = scmp.lt.s32.totalorder %s817_s20, 4  ;;  %p1093_p5 = scmp.ge.s32.totalorder %s817_s20, 1 }
  0x2c   : > { %s967_s15 = scalar_lea.hbm %s1084_s1, %s544_s29  ;;  %s207_s23 = scalar_lea.vmem [#allocation6], %s543_s30 }
  0x2d   : > { %p958_p6 = pnand %p1093_p5, %p1092_p1  ;;  %s216_s24 = sshll.u32 %s207_s23, 4  ;;  %s217_s24 = int_to_ptr.vmem [resolvable:$true] %s216_s24 }
  0x2e   : > { %s204_s7 = scalar_lea.sflag [#allocation7], %s905_s28  ;;  %s673_s9 = scalar_lea.hbm %s967_s15, 128 }
  0x2f   : > { %s1094_s12 = scalar_select %p958_p6, 1, 0 }
  0x30   : > { %p674_p10 = scmp.ne.s32.totalorder %s967_s15, %s673_s9  ;;  %s678_s29 = scalar_lea.hbm %s1084_s1, 384 }
  0x31   : > { %p679_p12 = scmp.lt.u32.totalorder %s967_s15, %s1084_s1  ;;  %p680_p0 = scmp.lt.u32.totalorder %s678_s29, %s673_s9 }
  0x32   : > { %p676_p11 = pnand %p674_p10, %p645_p13  ;;  %p682_p3 = scmp.lt.u32.totalorder %s673_s9, %s967_s15 }
  0x33   : > { %p681_p2 = por %p680_p0, %p679_p12 }
  0x34   : > { %p677_p8 = pneg %p676_p11 }
  0x35   : > { %p683_p4 = por %p682_p3, %p681_p2 }
  0x37   : > { %p684_p1 = pnand %p683_p4, %p677_p8 }
  0x39   : > { %687 = shalt.err (!%p684_p1)
}
  0x3a   : > { %s688_s28 = scalar_lea.vmem %s217_s24, 128  ;;  %s820_s30 = smov [#allocation6]  }
  0x3b   : > { %p689_p5 = scmp.ne.s32.totalorder %s217_s24, %s688_s28  ;;  %s693_s8 = sshll.u32 %s820_s30, 4  ;;  %s694_s8 = int_to_ptr.vmem [resolvable:$false] %s693_s8 }
  0x3c   : > { %s695_s13 = scalar_lea.vmem %s694_s8, 256  ;;  %p696_p7 = scmp.lt.s32.totalorder %s217_s24, %s694_s8 }
  0x3d   : > { %p691_p10 = pnand %p689_p5, %p645_p13  ;;  %p697_p6 = scmp.lt.s32.totalorder %s695_s13, %s688_s28 }
  0x3f   : > { %p692_p11 = pneg %p691_p10  ;;  %p698_p0 = por %p697_p6, %p696_p7 }
  0x41   : > { %p699_p12 = pnand %p698_p0, %p692_p11 }
  0x43   : > { %702 = shalt.err (!%p699_p12)
}
  0x44   : > { %584 = dma.hbm_to_vmem [thread:$0]  (!%p920_p9), %s967_s15, 128, %s217_s24, %s204_s7  }
  0x45   : > { %p1095_p8 = scmp.ne.s32.totalorder %s1094_s12, 0 }
  0x46   : > { %s227_s14 = sand.u32 (!%p1095_p8), 1, %s801_s16   ;;  %p1096_p13 = scmp.ne.s32.totalorder (!%p1095_p8), %s1090_s26, 0 }
  0x47   : > { %225 = sbr.rel (%p1095_p8) target bundleno = 510 (0x1fe), region = 28  ;;  %s548_s23 = sshll.u32 (!%p1095_p8), %s227_s14, 3 }
  0x48   : > { %s228_s9 = scalar_lea.sflag (!%p1095_p8), [#allocation4], %s227_s14  ;;  %s231_s11 = scalar_lea.vmem (!%p1095_p8), [#allocation3], %s548_s23 }
  0x4e   : > { %780 = dma.done.wait (%p1096_p13), %s228_s9, 128  }
  0x4f   : > { %782 = vsyncadd (%p1096_p13), %s228_s9, 4294967168  ;;  %s237_s25 = scalar_lea.sflag [#allocation7], %s227_s14  ;;  %s240_s29 = scalar_lea.vmem [#allocation6], %s548_s23 }
  0x50   : > { %784 = dma.done.wait (%p1096_p13), %s237_s25, 128  }
  0x51   : > { %786 = vsyncadd (%p1096_p13), %s237_s25, 4294967168  ;;  %p550_p7 = scmp.ne.s32.totalorder %s809_s18, 0 }
  0x52   : > { %vm277_vm0 = vcmask (!%p550_p7), 64512   ;;  %v821_v0 = vmov (!%p550_p7), 0.0  }
  0x53   : > { %276 = sbr.rel (%p550_p7) target bundleno = 90 (0x5a), region = 40  ;;  %278 = vst.msk [vmem:[#allocation2] sm:$0xff] (!%p550_p7), %vm277_vm0, %v821_v0 }
  0x5a PF: > { %v281_v1 = vld [vmem:[%s240_s29] sm:$0xff]  ;;  %v822_v2 = vmov 0.0   ;;  %vm823_vm1 = vmmov 0   ;;  %v280_v3 = vld [vmem:[%s231_s11] sm:$0xff]  ;;  %vm353_vm2 = vcmask 64512   ;;  %p551_p9 = scmp.ne.s32.totalorder %s809_s18, 2 }
  0x5b   : > { %561 = vmatprep.subr.mxu0 %v822_v2  ;;  %563 = vmatprep.mubr.msk.f32.mxu0 %vm823_vm1, %v822_v2  ;;  %v279_v4 = vld [vmem:[#allocation2] sm:$0xff]  ;;  %v360_v8 = vlaneseq (!%p551_p9)  ;;  %vm376_vm4 = vcmask (!%p551_p9), 57344   ;;  %vm389_vm5 = vcmask (!%p551_p9), 7168  }
  0x5c   : > { %562 = vmatpush3.xpose.msra.mxu0 %v281_v1 }
  0x5d   : > { %v361_v10 = vshrl.u32 (!%p551_p9), %v360_v8, 7  ;;  %v363_v11 = vand.u32 (!%p551_p9), 127, %v360_v8 }
  0x5f   : > { %564 = vmatmul.mubr.f32.vlgmr.msra.gmra.mrb[0].mxu0 %v280_v3  ;;  %vm367_vm3 = vcmp.eq.s32.totalorder (!%p551_p9), %v361_v10, %v363_v11 }
 0x12f   : > { %358 = sbr.rel (%p551_p9) target bundleno = 462 (0x1ce), region = 44 }
 0x132   : > { %v348_v5 = vpop.f32.mrb[0].mxu0 }
 0x133   : > { %v352_v6 = vadd.f32 %v348_v5, %v279_v4  ;;  %v565_v7 = vpop.f32.mrb[1].mxu0 }
 0x135   : > { %354 = vst.msk [vmem:[#allocation2] sm:$0xff] %vm353_vm2, %v352_v6 }
 0x13c   : > { %v359_v9 = vld [vmem:[#allocation2] sm:$0xff] }
 0x13d   : > { %v368_v12 = vsel %vm367_vm3, %v359_v9, 0.0  ;;  %v378_v13 = vsel %vm367_vm3, 0.0, %v359_v9 }
 0x13e   : > { %v369_v14 = vsel %vm353_vm2, %v368_v12, 0.0  ;;  %v379_v15 = vsel %vm353_vm2, %v378_v13, -inf }
 0x13f   : > { %v370_v16 = vrot.slane %v369_v14, 4  ;;  %v380_v17 = vrot.slane %v379_v15, 4  ;;  %387 = vmax.xlane.f32.xlu0 %v379_v15 }
 0x141   : > { %v371_v18 = vadd.f32 %v370_v16, %v369_v14  ;;  %v381_v19 = vmax.f32 %v379_v15, %v380_v17 }
 0x143   : > { %v372_v20 = vrot.slane %v371_v18, 2  ;;  %v382_v21 = vrot.slane %v381_v19, 2 }
 0x145   : > { %v373_v22 = vadd.f32 %v372_v20, %v371_v18  ;;  %v383_v23 = vmax.f32 %v381_v19, %v382_v21 }
 0x147   : > { %v374_v24 = vrot.slane %v373_v22, 1  ;;  %v384_v25 = vrot.slane %v383_v23, 1 }
 0x149   : > { %v375_v26 = vadd.f32 %v374_v24, %v373_v22  ;;  %v385_v27 = vmax.f32 %v383_v23, %v384_v25 }
 0x14b   : > { %377 = vst.msk [vmem:[#allocation9] sm:$0x1] %vm376_vm4, %v375_v26  ;;  %386 = vst.msk [vmem:[#allocation8] sm:$0x1] %vm376_vm4, %v385_v27 }
 0x1cc   : > { %v388_v28 = vpop.xlane.xlu0 %387 }
 0x1cd   : > { %390 = vst.msk [vmem:[%s1087_s4] sm:$0xff] %vm389_vm5, %v388_v28 }
 0x1ce PF: > { %p1009_p6 = scmp.eq.s32.totalorder %s540_s21, 2  ;;  %s824_s12 = smov [#allocation8]  }
 0x1cf   : > { %s404_s15 = sshll.u32 %s824_s12, 4  ;;  %s825_s24 = smov [#allocation9]   ;;  %s405_s15 = int_to_ptr.vmem [resolvable:$true] %s404_s15 }
 0x1d0   : > { %s417_s7 = sshll.u32 %s825_s24, 4  ;;  %s703_s5 = scalar_lea.vmem %s405_s15, 16  ;;  %s1013_s7 = int_to_ptr.vmem [resolvable:$true] %s417_s7 }
 0x1d1   : > { %p704_p2 = scmp.ne.s32.totalorder %s405_s15, %s703_s5  ;;  %s709_s6 = scalar_lea.vmem %s405_s15, 32 }
 0x1d2   : > { %p710_p1 = scmp.lt.s32.totalorder %s405_s15, %s405_s15  ;;  %p711_p5 = scmp.lt.s32.totalorder %s709_s6, %s703_s5 }
 0x1d3   : > { %p705_p3 = pnand %p704_p2, %p1009_p6 }
 0x1d4   : > { %p712_p10 = por %p711_p5, %p710_p1 }
 0x1d5   : > { %p706_p4 = pneg %p705_p3 }
 0x1d7   : > { %p713_p11 = pnand %p712_p10, %p706_p4 }
 0x1d9   : > { %716 = shalt.err (!%p713_p11)
}
 0x1da   : > { %s717_s30 = scalar_lea.hbm %s1085_s2, 16 }
 0x1db   : > { %p718_p0 = scmp.ne.s32.totalorder %s1085_s2, %s717_s30  ;;  %p723_p13 = scmp.lt.u32.totalorder %s717_s30, %s1085_s2 }
 0x1dd   : > { %p719_p12 = pnand %p718_p0, %p1009_p6 }
 0x1df   : > { %p720_p8 = pneg %p719_p12 }
 0x1e1   : > { %p725_p7 = pnand %p723_p13, %p720_p8 }
 0x1e3   : > { %728 = shalt.err (!%p725_p7)
}
 0x1e4   : > { %571 = dma.vmem_to_hbm [thread:$0]  (%p1009_p6), %s405_s15, 16, %s1085_s2, [#allocation5]  }
 0x1e5   : > { %s729_s25 = scalar_lea.vmem %s1013_s7, 16  ;;  %s735_s29 = scalar_lea.vmem %s1013_s7, 32 }
 0x1e6   : > { %p730_p9 = scmp.ne.s32.totalorder %s1013_s7, %s729_s25  ;;  %p736_p4 = scmp.lt.s32.totalorder %s1013_s7, %s1013_s7 }
 0x1e7   : > { %p737_p1 = scmp.lt.s32.totalorder %s735_s29, %s729_s25 }
 0x1e8   : > { %p731_p2 = pnand %p730_p9, %p1009_p6 }
 0x1e9   : > { %p738_p5 = por %p737_p1, %p736_p4 }
 0x1ea   : > { %p732_p3 = pneg %p731_p2 }
 0x1ec   : > { %p739_p10 = pnand %p738_p5, %p732_p3 }
 0x1ee   : > { %742 = shalt.err (!%p739_p10)
}
 0x1ef   : > { %s743_s12 = scalar_lea.hbm %s1086_s3, 16 }
 0x1f0   : > { %p744_p11 = scmp.ne.s32.totalorder %s1086_s3, %s743_s12  ;;  %p749_p8 = scmp.lt.u32.totalorder %s743_s12, %s1086_s3 }
 0x1f2   : > { %p745_p0 = pnand %p744_p11, %p1009_p6 }
 0x1f4   : > { %p746_p12 = pneg %p745_p0 }
 0x1f6   : > { %p751_p13 = pnand %p749_p8, %p746_p12 }
 0x1f8   : > { %754 = shalt.err (!%p751_p13)
}
 0x1f9   : > { %573 = dma.vmem_to_hbm [thread:$0]  (%p1009_p6), %s1013_s7, 16, %s1086_s3, [#allocation10]  }
 0x1fa   : > { %788 = dma.done.wait (%p1009_p6), [#allocation5], 16  }
 0x1fb   : > { %790 = vsyncadd (%p1009_p6), [#allocation5], 4294967280 }
 0x1fc   : > { %792 = dma.done.wait (%p1009_p6), [#allocation10], 16  }
 0x1fd   : > { %794 = vsyncadd (%p1009_p6), [#allocation10], 4294967280 }
 0x1fe PF: > { %s23_s20 = sadd.s32 1, %s817_s20   ;;  %s1098_s15 = smov %s801_s16 }
 0x1ff   : > { %p20_p7 = scmp.ge.s32.totalorder %s23_s20, 5   ;;  %s1099_s16 = smov %s805_s17 }
 0x200   : > { %s1100_s17 = smov %s902_s27  ;;  %s1101_s18 = smov %s813_s19 }
 0x201   : > { %s1102_s19 = smov %s1104_s22  ;;  %22 = sbr.rel (!%p20_p7) target bundleno = 8 (0x8), region = 108 }
 0x208   :  { %444 = vsyncpa [#allocation4], 1 }
 0x209   :  { %446 = vsyncpa [#allocation4 + $0x1], 1 }
 0x20a   :  { %447 = vsyncpa [#allocation7], 1 }
 0x20b   :  { %449 = vsyncpa [#allocation7 + $0x1], 1 }
 0x20c   :  { %450 = vsyncpa [#allocation5], 1 }
 0x20d   :  { %452 = vsyncpa [#allocation5 + $0x1], 1 }
 0x20e   :  { %453 = vsyncpa [#allocation10], 1 }

</bundles_post_ra>
